<compile_context>
chip_gen: v7x
topology: tpu7x:2x2x1
jax: 0.10.0
libtpu: 0.0.40
codegen_flags: <defaults>
</compile_context>

<pallas_src>
import functools

import jax
import jax.numpy as jnp
from jax.experimental import pallas as pl
from jax.experimental.pallas import tpu as pltpu

FACTORS = [1, 1, 1, 1, 1 / 2, 1 / 4, 1 / 8, 1 / 16, 1 / 32]
LEAKY_SLOPE = 0.2

# MXU operand / inter-block activation dtype (f32 accumulation everywhere).
MXU_DTYPE = jnp.bfloat16
ACT_DTYPE = jnp.bfloat16


def _default_vmem_limit():
    """Generation-aware scoped-VMEM budget (v5e/v6e: 96 MiB, v7x: 48 MiB)."""
    try:
        cap = int(pltpu.get_tpu_info().vmem_capacity_bytes)
    except Exception:
        cap = 64 * 1024 * 1024
    return min((cap * 3) // 4, 96 * 1024 * 1024)


VMEM_LIMIT = _default_vmem_limit()


# ----------------------- in-kernel value-level helpers -----------------------

def _leaky(x):
    return jnp.where(x >= 0, x, LEAKY_SLOPE * x)


def _pad_hw(x, pad):
    """Zero-pad H and W of an (N, H, W, C) value in-kernel.
    TODO(synk): replace with a zero-initialized VMEM scratch + interior store."""
    if pad == 0:
        return x
    n, h, w, c = x.shape
    zc = jnp.zeros((n, h, pad, c), x.dtype)
    x = jnp.concatenate([zc, x, zc], axis=2)
    zr = jnp.zeros((n, pad, w + 2 * pad, c), x.dtype)
    return jnp.concatenate([zr, x, zr], axis=1)


def _conv2d(xp, w2d, b, kh, kw, apply_leaky):
    """VALID conv on an already-padded (N, Hp, Wp, C) bf16 value as per-tap
    matmul accumulation (no 9x im2col buffer); bias + LeakyReLU fused.
    Returns float32 (N, Ho, Wo, Cout)."""
    n, hp, wp, c = xp.shape
    ho, wo = hp - kh + 1, wp - kw + 1
    cout = w2d.shape[-1]
    m = n * ho * wo
    if kh == 1 and kw == 1:
        acc = jnp.dot(xp.reshape(m, c), w2d, preferred_element_type=jnp.float32)
    else:
        acc = jnp.zeros((m, cout), jnp.float32)
        for dh in range(kh):
            for dw in range(kw):
                t = dh * kw + dw
                tap = xp[:, dh:dh + ho, dw:dw + wo, :].reshape(m, c)
                acc = acc + jnp.dot(tap, w2d[t * c:(t + 1) * c, :],
                                    preferred_element_type=jnp.float32)
    acc = acc + b
    if apply_leaky:
        acc = _leaky(acc)
    return acc.reshape(n, ho, wo, cout)


def _pool2x2(x):
    """AvgPool2d(2, 2) on an (N, H, W, C) value via reshape-and-add (VPU only)."""
    n, h, w, c = x.shape
    x = x.reshape(n, h, w // 2, 2, c).sum(axis=3)
    x = x.reshape(n, h // 2, 2, w // 2, c).sum(axis=2)
    return x * 0.25


# --------------------------------- kernels -----------------------------------

def _wsconv_kernel(x_ref, w_ref, b_ref, o_ref, *, kh, kw, pad, apply_leaky,
                   pre_pool, post_pool):
    """WSConv2d (scale folded into w) + bias [+ LeakyReLU], with an optionally
    fused 2x2 avg-pool before (rgb(avg_pool(x)) path) or after the conv."""
    x = x_ref[...].astype(jnp.float32)        # (B, H, W, Cin)
    if pre_pool:
        x = _pool2x2(x)
    x = x.astype(MXU_DTYPE)                   # bf16 before pad / tap slicing
    y = _conv2d(_pad_hw(x, pad), w_ref[...], b_ref[...], kh, kw, apply_leaky)
    if post_pool:
        y = _pool2x2(y)
    o_ref[...] = y.astype(o_ref.dtype)


def _conv_block_kernel(*refs, post_pool, fade):
    """Fused ConvBlock (use_pixelnorm=False): conv3x3+leaky -> conv3x3+leaky
    [-> 2x2 avg-pool] [-> fade_in with `downscaled`], entirely in VMEM."""
    if fade:
        (x_ref, w1_ref, b1_ref, w2_ref, b2_ref,
         down_ref, alpha_ref, o_ref) = refs
    else:
        x_ref, w1_ref, b1_ref, w2_ref, b2_ref, o_ref = refs
    x = x_ref[...].astype(MXU_DTYPE)          # (B, H, W, Cin)
    y = _conv2d(_pad_hw(x, 1), w1_ref[...], b1_ref[...], 3, 3, True)
    y = _conv2d(_pad_hw(y.astype(MXU_DTYPE), 1), w2_ref[...], b2_ref[...],
                3, 3, True)                    # f32
    if post_pool:
        y = _pool2x2(y)
    if fade:
        a = alpha_ref[0]
        y = a * y + (1.0 - a) * down_ref[...].astype(jnp.float32)
    o_ref[...] = y.astype(o_ref.dtype)


def _final_kernel(*refs, fuse_block):
    """[optional fused last ConvBlock + pool] -> minibatch_std -> final_block:
    conv3x3(pad1)+leaky -> conv4x4(pad0)+leaky -> conv1x1 -> (N, 1)."""
    if fuse_block:
        (x_ref, wb1_ref, bb1_ref, wb2_ref, bb2_ref,
         w1_ref, b1_ref, w2_ref, b2_ref, w3_ref, b3_ref, o_ref) = refs
        x = x_ref[...].astype(MXU_DTYPE)                       # (N, 8, 8, C)
        y = _conv2d(_pad_hw(x, 1), wb1_ref[...], bb1_ref[...], 3, 3, True)
        y = _conv2d(_pad_hw(y.astype(MXU_DTYPE), 1), wb2_ref[...],
                    bb2_ref[...], 3, 3, True)
        x = _pool2x2(y)                                        # f32 (N, 4, 4, C)
    else:
        x_ref, w1_ref, b1_ref, w2_ref, b2_ref, w3_ref, b3_ref, o_ref = refs
        x = x_ref[...].astype(jnp.float32)                     # (N, 4, 4, C)
    n = x.shape[0]
    mean = jnp.mean(x, axis=0, keepdims=True)
    # unbiased like torch.std; max(n-1, 1) guards the degenerate batch==1 case
    var = jnp.sum((x - mean) ** 2, axis=0) / max(n - 1, 1)
    stat = jnp.mean(jnp.sqrt(var))                             # scalar
    feat = jnp.full(x.shape[:3] + (1,), stat, jnp.float32)
    xc = jnp.concatenate([x, feat], axis=-1).astype(MXU_DTYPE)  # (N, 4, 4, C+1)
    y = _conv2d(_pad_hw(xc, 1), w1_ref[...], b1_ref[...], 3, 3, True)
    y = _conv2d(y.astype(MXU_DTYPE), w2_ref[...], b2_ref[...], 4, 4, True)
    y = _conv2d(y.astype(MXU_DTYPE), w3_ref[...], b3_ref[...], 1, 1, False)
    o_ref[...] = y.reshape(n, 1)                               # .view(N, -1)


# -------------------------------- wrappers ------------------------------------

def ws_conv2d(x, fp, *, apply_leaky, pre_pool=False, post_pool=False):
    n, hin, win, cin = x.shape
    kh, kw, pad, cout = fp["kh"], fp["kw"], fp["pad"], fp["cout"]
    h, w = (hin // 2, win // 2) if pre_pool else (hin, win)
    ho, wo = h + 2 * pad - kh + 1, w + 2 * pad - kw + 1
    if post_pool:
        ho, wo = ho // 2, wo // 2
    kernel = functools.partial(_wsconv_kernel, kh=kh, kw=kw, pad=pad,
                               apply_leaky=apply_leaky,
                               pre_pool=pre_pool, post_pool=post_pool)
    return pl.pallas_call(
        kernel,
        out_shape=jax.ShapeDtypeStruct((n, ho, wo, cout), ACT_DTYPE),
        grid=(n,),
        in_specs=[
            pl.BlockSpec((1, hin, win, cin), lambda b: (b, 0, 0, 0)),
            pl.BlockSpec((kh * kw * cin, cout), lambda b: (0, 0)),
            pl.BlockSpec((1, cout), lambda b: (0, 0)),
        ],
        out_specs=pl.BlockSpec((1, ho, wo, cout), lambda b: (b, 0, 0, 0)),
        compiler_params=pltpu.CompilerParams(
            dimension_semantics=("parallel",),
            vmem_limit_bytes=VMEM_LIMIT),
    )(x, fp["w2d"], fp["b"])


def conv_block(x, bp, *, post_pool, fade=None):
    n, h, w, cin = x.shape
    cout = bp["conv1"]["cout"]
    ho, wo = (h // 2, w // 2) if post_pool else (h, w)
    # Low-resolution tail: one program processes the whole batch (M = N*H*W).
    nb = n if (h * w <= 64) else 1
    kernel = functools.partial(_conv_block_kernel, post_pool=post_pool,
                               fade=fade is not None)
    in_arrays = [x, bp["conv1"]["w2d"], bp["conv1"]["b"],
                 bp["conv2"]["w2d"], bp["conv2"]["b"]]
    in_specs = [
        pl.BlockSpec((nb, h, w, cin), lambda b: (b, 0, 0, 0)),
        pl.BlockSpec((9 * cin, cout), lambda b: (0, 0)),
        pl.BlockSpec((1, cout), lambda b: (0, 0)),
        pl.BlockSpec((9 * cout, cout), lambda b: (0, 0)),
        pl.BlockSpec((1, cout), lambda b: (0, 0)),
    ]
    if fade is not None:
        alpha, down = fade
        alpha_arr = jnp.asarray(alpha, jnp.float32).reshape(1)
        in_arrays += [down, alpha_arr]
        in_specs += [
            pl.BlockSpec((nb, ho, wo, cout), lambda b: (b, 0, 0, 0)),
            pl.BlockSpec(memory_space=pltpu.MemorySpace.SMEM),   # alpha scalar
        ]
    return pl.pallas_call(
        kernel,
        out_shape=jax.ShapeDtypeStruct((n, ho, wo, cout), ACT_DTYPE),
        grid=(n // nb,),
        in_specs=in_specs,
        out_specs=pl.BlockSpec((nb, ho, wo, cout), lambda b: (b, 0, 0, 0)),
        compiler_params=pltpu.CompilerParams(
            dimension_semantics=("parallel",),
            vmem_limit_bytes=VMEM_LIMIT),
    )(*in_arrays)


def final_block(x, fps, *, last_bp=None):
    """Cross-batch minibatch-std + final convs (optionally fused with the last
    prog ConvBlock) in a single program; output is (N, 1) float32."""
    n = x.shape[0]
    fuse = last_bp is not None
    kernel = functools.partial(_final_kernel, fuse_block=fuse)
    ins = [x]
    if fuse:
        for p in (last_bp["conv1"], last_bp["conv2"]):
            ins += [p["w2d"], p["b"]]
    for p in fps:
        ins += [p["w2d"], p["b"]]
    specs = [pl.BlockSpec(memory_space=pltpu.MemorySpace.VMEM)] * len(ins)
    return pl.pallas_call(
        kernel,
        out_shape=jax.ShapeDtypeStruct((n, 1), jnp.float32),
        in_specs=specs,
        out_specs=pl.BlockSpec(memory_space=pltpu.MemorySpace.VMEM),
        compiler_params=pltpu.CompilerParams(vmem_limit_bytes=VMEM_LIMIT),
    )(*ins)


def prepare_params(params):
    """Fold the WSConv2d scale into the weights, reshape to (KH*KW*Cin, Cout)
    and cast to bf16 ONCE (not per forward call)."""
    def fold(p):
        kh, kw, cin, cout = p["w"].shape
        return {
            "w2d": (p["w"] * p["scale"]).reshape(kh * kw * cin, cout).astype(MXU_DTYPE),
            "b": p["b"].astype(jnp.float32),
            "kh": kh, "kw": kw, "cin": cin, "cout": cout, "pad": p["pad"],
        }
    return {
        "rgb": [fold(p) for p in params["rgb"]],
        "prog": [{"conv1": fold(bp["conv1"]), "conv2": fold(bp["conv2"])}
                 for bp in params["prog"]],
        "final": [fold(p) for p in params["final"]],
    }


def discriminator_forward(prepared, x_nchw, alpha, steps):
    """Mirrors Discriminator.forward(x, alpha, steps); steps is a static int."""
    # TODO(synk): at production resolutions consume NCHW directly in the rgb
    # kernel (spatial on the lane dim) and drop this wrapper transpose.
    x = jnp.transpose(x_nchw, (0, 2, 3, 1)).astype(jnp.float32)  # NCHW -> NHWC
    num_blocks = len(prepared["prog"])                           # = len(factors)-1
    cur = num_blocks - steps
    out = ws_conv2d(x, prepared["rgb"][cur], apply_leaky=True)
    if steps == 0:
        return final_block(out, prepared["final"])
    # leaky(rgb(avg_pool(x))): pool fused as the 1x1-conv prologue.
    down = ws_conv2d(x, prepared["rgb"][cur + 1], apply_leaky=True, pre_pool=True)
    # avg_pool(prog_block(out)) + fade_in fused into one kernel.
    out = conv_block(out, prepared["prog"][cur], post_pool=True, fade=(alpha, down))
    # middle blocks (all but the last, which is fused into final_block).
    for s in range(cur + 1, num_blocks - 1):
        out = conv_block(out, prepared["prog"][s], post_pool=True)
    if steps >= 2:
        return final_block(out, prepared["final"],
                           last_bp=prepared["prog"][num_blocks - 1])
    return final_block(out, prepared["final"])


# ----------------------------- parameter init --------------------------------

def make_wsconv_params(key, cin, cout, k, pad):
    # nn.init.normal_(weight) (mean 0, std 1); zero bias; WSConv2d scale.
    return {
        "w": jax.random.normal(key, (k, k, cin, cout), jnp.float32),
        "b": jnp.zeros((1, cout), jnp.float32),
        "scale": float((2.0 / (cin * k * k)) ** 0.5),
        "pad": pad,
    }


def make_discriminator_params(key, in_channels, img_channels=3):
    keys = iter(jax.random.split(key, 32))
    prog, rgb = [], []
    for i in range(len(FACTORS) - 1, 0, -1):
        conv_in = int(in_channels * FACTORS[i])
        conv_out = int(in_channels * FACTORS[i - 1])
        prog.append({
            "conv1": make_wsconv_params(next(keys), conv_in, conv_out, 3, 1),
            "conv2": make_wsconv_params(next(keys), conv_out, conv_out, 3, 1),
        })
        rgb.append(make_wsconv_params(next(keys), img_channels, conv_in, 1, 0))
    rgb.append(make_wsconv_params(next(keys), img_channels, in_channels, 1, 0))
    final = [
        make_wsconv_params(next(keys), in_channels + 1, in_channels, 3, 1),
        make_wsconv_params(next(keys), in_channels, in_channels, 4, 0),
        make_wsconv_params(next(keys), in_channels, 1, 1, 0),
    ]
    return {"prog": prog, "rgb": rgb, "final": final}


# ------------------------- pure-JAX reference (f32) ---------------------------

def _ref_wsconv(x, p, leaky):
    y = jax.lax.conv_general_dilated(
        x, p["w"] * p["scale"], (1, 1),
        [(p["pad"], p["pad"]), (p["pad"], p["pad"])],
        dimension_numbers=("NHWC", "HWIO", "NHWC")) + p["b"].reshape(1, 1, 1, -1)
    return jnp.where(y >= 0, y, LEAKY_SLOPE * y) if leaky else y


def _ref_pool(x):
    n, h, w, c = x.shape
    return x.reshape(n, h // 2, 2, w // 2, 2, c).mean(axis=(2, 4))


def reference_forward(params, x_nchw, alpha, steps):
    x = jnp.transpose(x_nchw, (0, 2, 3, 1)).astype(jnp.float32)
    nb = len(params["prog"])
    cur = nb - steps

    def block(o, bp):
        o = _ref_wsconv(o, bp["conv1"], True)
        return _ref_wsconv(o, bp["conv2"], True)

    def final(o):
        n = o.shape[0]
        std = jnp.sqrt(jnp.sum((o - o.mean(0, keepdims=True)) ** 2, axis=0)
                       / max(n - 1, 1))
        feat = jnp.full(o.shape[:3] + (1,), std.mean(), o.dtype)
        o = jnp.concatenate([o, feat], axis=-1)
        o = _ref_wsconv(o, params["final"][0], True)
        o = _ref_wsconv(o, params["final"][1], True)
        o = _ref_wsconv(o, params["final"][2], False)
        return o.reshape(n, -1)

    out = _ref_wsconv(x, params["rgb"][cur], True)
    if steps == 0:
        return final(out)
    down = _ref_wsconv(_ref_pool(x), params["rgb"][cur + 1], True)
    out = _ref_pool(block(out, params["prog"][cur]))
    out = alpha * out + (1 - alpha) * down
    for s in range(cur + 1, nb):
        out = _ref_pool(block(out, params["prog"][s]))
    return final(out)


# ----------------------------------- main -------------------------------------

if __name__ == "__main__":
    IN_CHANNELS = 32
    IMG_CHANNELS = 3
    BATCH = 2                       # minibatch_std wants batch >= 2
    STEPS = 2                       # image size = 4 * 2**STEPS = 16
    IMG = 4 * (2 ** STEPS)

    key = jax.random.PRNGKey(0)
    pkey, xkey = jax.random.split(key)
    params = make_discriminator_params(pkey, IN_CHANNELS, IMG_CHANNELS)
    prepared = prepare_params(params)
    x = jax.random.normal(xkey, (BATCH, IMG_CHANNELS, IMG, IMG), jnp.float32)
    alpha = jnp.float32(0.5)

    out = discriminator_forward(prepared, x, alpha, STEPS)
    out = jax.block_until_ready(out)
    assert out.shape == (BATCH, 1), out.shape
    assert bool(jnp.all(jnp.isfinite(out)))

    # Loose tolerance vs. the f32 XLA reference (bf16 MXU operands / bf16
    # inter-block activations break exact bit parity by design).
    ref = jax.block_until_ready(reference_forward(params, x, alpha, STEPS))
    err = float(jnp.max(jnp.abs(out - ref)))
    scale = float(jnp.max(jnp.abs(ref))) + 1.0
    assert err <= 0.1 * scale, (err, scale)

    print("KERNEL_OK")
</pallas_src>

<mosaic_0001>
module attributes {stable_mosaic.version = 11 : i64} {
  func.func @_wsconv_kernel(%arg0: i32, %arg1: memref<1x16x16x3xf32, #tpu.memory_space<vmem>>, %arg2: memref<3x32xbf16, #tpu.memory_space<vmem>>, %arg3: memref<1x32xf32, #tpu.memory_space<vmem>>, %arg4: memref<1x16x16x32xbf16, #tpu.memory_space<vmem>>) attributes {dimension_semantics = [#tpu.dimension_semantics<parallel>], iteration_bounds = array<i64: 2>, scalar_prefetch = 0 : i64, scratch_operands = 0 : i64, tpu.core_type = #tpu.core_type<tc>, window_params = [{transform_indices = @transform_0, window_bounds = array<i64: 1, 16, 16, 3>}, {pipeline_mode = #tpu.pipeline_mode<synchronous>, transform_indices = @transform_1, window_bounds = array<i64: 3, 32>}, {pipeline_mode = #tpu.pipeline_mode<synchronous>, transform_indices = @transform_2, window_bounds = array<i64: 1, 32>}, {transform_indices = @transform_3, window_bounds = array<i64: 1, 16, 16, 32>}]} {
    %c0 = arith.constant 0 : index
    %c0_0 = arith.constant 0 : index
    %c0_1 = arith.constant 0 : index
    %c0_2 = arith.constant 0 : index
    %0 = vector.load %arg1[%c0, %c0_0, %c0_1, %c0_2] : memref<1x16x16x3xf32, #tpu.memory_space<vmem>>, vector<1x16x16x3xf32>
    %1 = arith.truncf %0 : vector<1x16x16x3xf32> to vector<1x16x16x3xbf16>
    %c0_3 = arith.constant 0 : index
    %c0_4 = arith.constant 0 : index
    %2 = vector.load %arg2[%c0_3, %c0_4] : memref<3x32xbf16, #tpu.memory_space<vmem>>, vector<3x32xbf16>
    %c0_5 = arith.constant 0 : index
    %c0_6 = arith.constant 0 : index
    %3 = vector.load %arg3[%c0_5, %c0_6] : memref<1x32xf32, #tpu.memory_space<vmem>>, vector<1x32xf32>
    %4 = vector.shape_cast %1 : vector<1x16x16x3xbf16> to vector<256x3xbf16>
    %cst = arith.constant dense<0.000000e+00> : vector<256x32xf32>
    %5 = tpu.matmul %4, %2, %cst {dimension_numbers = #tpu.dot_dimension_numbers<[1], [0], [0], [1], [0, 0, 1, 1], [], []>} : vector<256x3xbf16>, vector<3x32xbf16>, vector<256x32xf32> -> vector<256x32xf32>
    %6 = vector.broadcast %3 : vector<1x32xf32> to vector<256x32xf32>
    %7 = arith.addf %5, %6 : vector<256x32xf32>
    %cst_7 = arith.constant 0.000000e+00 : f32
    %8 = vector.broadcast %cst_7 : f32 to vector<256x32xf32>
    %9 = arith.cmpf oge, %7, %8 : vector<256x32xf32>
    %cst_8 = arith.constant 2.000000e-01 : f32
    %10 = vector.broadcast %cst_8 : f32 to vector<256x32xf32>
    %11 = arith.mulf %10, %7 : vector<256x32xf32>
    %12 = arith.select %9, %7, %11 : vector<256x32xi1>, vector<256x32xf32>
    %13 = vector.shape_cast %12 : vector<256x32xf32> to vector<1x16x16x32xf32>
    %14 = arith.truncf %13 : vector<1x16x16x32xf32> to vector<1x16x16x32xbf16>
    %c0_9 = arith.constant 0 : index
    %c0_10 = arith.constant 0 : index
    %c0_11 = arith.constant 0 : index
    %c0_12 = arith.constant 0 : index
    %15 = vector.load %arg4[%c0_9, %c0_10, %c0_11, %c0_12] : memref<1x16x16x32xbf16, #tpu.memory_space<vmem>>, vector<1x16x16x32xbf16>
    tpu.vector_store %arg4[%c0_9, %c0_10, %c0_11, %c0_12], %14 {strides = array<i32>} : memref<1x16x16x32xbf16, #tpu.memory_space<vmem>>, vector<1x16x16x32xbf16>,
    return
  }
  func.func @transform_0(%arg0: i32) -> (i32, i32, i32, i32) {
    %c0_i32 = arith.constant 0 : i32
    %c0_i32_0 = arith.constant 0 : i32
    %c0_i32_1 = arith.constant 0 : i32
    %c0_i32_2 = arith.constant 0 : i32
    return %arg0, %c0_i32, %c0_i32_0, %c0_i32_1 : i32, i32, i32, i32
  }
  func.func @transform_1(%arg0: i32) -> (i32, i32) {
    %c0_i32 = arith.constant 0 : i32
    %c0_i32_0 = arith.constant 0 : i32
    %c0_i32_1 = arith.constant 0 : i32
    return %c0_i32, %c0_i32_0 : i32, i32
  }
  func.func @transform_2(%arg0: i32) -> (i32, i32) {
    %c0_i32 = arith.constant 0 : i32
    %c0_i32_0 = arith.constant 0 : i32
    %c0_i32_1 = arith.constant 0 : i32
    return %c0_i32, %c0_i32_0 : i32, i32
  }
  func.func @transform_3(%arg0: i32) -> (i32, i32, i32, i32) {
    %c0_i32 = arith.constant 0 : i32
    %c0_i32_0 = arith.constant 0 : i32
    %c0_i32_1 = arith.constant 0 : i32
    %c0_i32_2 = arith.constant 0 : i32
    return %arg0, %c0_i32, %c0_i32_0, %c0_i32_1 : i32, i32, i32, i32
  }
}

</mosaic_0001>

<bundles_post_ra>
// kernel: tpu_custom_call.1
= control target key start
LH: loop header
LB: loop body
LE: loop exit
PB: predicated region body
PF: predicated region fallthrough
CT: control target
= control target key end

     0   :  { %8 = vsyncpa [#allocation3], 0  ;;  %s1320_s0 = inlined_call_operand.vmem [shape: f32[2,16,16,3], index: 0, kind: input, shape index: {}]   ;;  %s1321_s1 = inlined_call_operand.vmem [shape: bf16[3,32], index: 1, kind: input, shape index: {}]   ;;  %s1322_s2 = inlined_call_operand.vmem [shape: f32[1,32], index: 2, kind: input, shape index: {}]   ;;  %s1323_s3 = inlined_call_operand.hbm [shape: bf16[2,16,16,32], index: 3, kind: output, shape index: {}]  }
   0x1   :  { %10 = vsyncpa [#allocation3 + $0x1], 0  ;;  %s1054_s12 = smov 0   ;;  %s1056_s13 = smov 0  }
   0x2   :  { %s1058_s14 = smov 0   ;;  %s1060_s15 = smov 0  }
   0x3 LB: > { %s1075_s16 = sadd.s32 4294967295, %s1028_s15   ;;  %s776_s17 = sadd.s32 4294967294, %s1028_s15   ;;  %s1028_s15 = sphi %s1060_s15, %s1329_s15   ;;  %s1024_s14 = sphi %s1058_s14, %s1328_s14   ;;  %s1020_s13 = sphi %s1056_s13, %s1327_s13   ;;  %s1016_s12 = sphi %s1054_s12, %s1326_s12  }
   0x4   : > { %s1079_s18 = sadd.s32 1, %s1028_s15   ;;  %s91_s19 = sadd.s32 1, %s1024_s14 }
   0x5   : > { %s88_s20 = ssub.s32 %s1028_s15, %s1079_s18  ;;  %p101_p0 = scmp.ne.s32.totalorder %s1024_s14, %s1020_s13 }
   0x6   : > { %p89_p1 = scmp.eq.s32.totalorder %s88_s20, 0  ;;  %p102_p2 = scmp.eq.s32.totalorder %s1075_s16, 1 }
   0x7   : > { %p107_p3 = scmp.ne.s32.totalorder %s1020_s13, %s1016_s12  ;;  %p108_p4 = scmp.eq.s32.totalorder %s776_s17, 1 }
   0x8   : > { %s1090_s21 = scalar_select %p89_p1, %s1024_s14, %s91_s19  }
   0x9   : > { %p1092_p5 = por %p102_p2, %p101_p0  ;;  %p1096_p6 = por %p108_p4, %p107_p3 }
   0xa   : > { %p779_p7 = scmp.ge.s32.totalorder %s1028_s15, 1  ;;  %p140_p8 = scmp.lt.s32.totalorder %s1028_s15, 3 }
   0xc   : > { %p141_p9 = pnand %p779_p7, %p140_p8 }
   0xd   : > { %v218_v0 = vld [vmem:[%s1321_s1] sm:$0x3] (!%p141_p9)  ;;  %vm275_vm0 = vcmask (!%p141_p9), 1040384   ;;  %vm276_vm1 = vcmask (!%p141_p9), 1041408   ;;  %p164_p10 = scmp.lt.s32.totalorder (!%p141_p9), %s1075_s16, 1  ;;  %v1030_v1 = vmov (!%p141_p9), 65535  }
   0xe   : > { %144 = sbr.rel (%p141_p9) target bundleno = 301 (0x12d), region = 32  ;;  %v277_v2 = vsel (!%p141_p9), %vm275_vm0, 4294967295, %v1030_v1  ;;  %vm226_vm2 = vcmask (!%p141_p9), 23552   ;;  %v1163_v53 = vld [vmem:[%s1322_s2] ss:$0 sm:$0xff] (!%p141_p9)  ;;  %s161_s6 = sand.u32 (!%p141_p9), 1, %s1020_s13  }
   0xf   : > { %v278_v3 = vsel (!%p141_p9), %vm276_vm1, %v277_v2, 0  ;;  %s780_s7 = sshll.u32 (!%p141_p9), %s161_s6, 7  ;;  %vm667_vm3 = vcmask (!%p141_p9), 257024   ;;  %s870_s9 = sshll.u32 (!%p141_p9), %s1075_s16, 11 }
  0x10   : > { %v280_v4 = vand.u32 (!%p141_p9), %v278_v3, %v218_v0  ;;  %s1174_s8 = scalar_lea.vmem (!%p141_p9), [#allocation2], %s780_s7  ;;  %s1279_s19 = scalar_lea.sflag (!%p141_p9), [#allocation3], %s161_s6 }
  0x11   : > { %s714_s10 = sshll.u32 (!%p141_p9), %s1174_s8, 4  ;;  %s1031_s24 = smov (!%p141_p9), [#allocation2]   ;;  %s1267_s10 = int_to_ptr.vmem [resolvable:$true] %s714_s10 }
  0x12   : > { %888 = vmatprep.subr.bf16.mxu0 (!%p141_p9), %v280_v4  ;;  %922 = vmatprep.subr.bf16.mxu1 (!%p141_p9), %v280_v4  ;;  %s966_s20 = scalar_lea.vmem (!%p141_p9), %s1267_s10, 2048  ;;  %s970_s25 = sshll.u32 (!%p141_p9), %s1031_s24, 4  ;;  %s971_s25 = int_to_ptr.vmem [resolvable:$false] %s970_s25 }
  0x13   : > { %889 = vmatpush3.bf16.msra.mxu0 (!%p141_p9), %v280_v4  ;;  %923 = vmatpush3.bf16.msra.mxu1 (!%p141_p9), %v280_v4  ;;  %p967_p11 = scmp.ne.s32.totalorder (!%p141_p9), %s1267_s10, %s966_s20  ;;  %p973_p0 = scmp.lt.s32.totalorder (!%p141_p9), %s1267_s10, %s971_s25 }
  0x15   : > { %s165_s26 = scalar_select %p164_p10, %s1075_s16, 1 }
  0x16   : > { %s1265_s16 = scalar_lea.hbm %s1323_s3, %s870_s9  ;;  %p968_p12 = pnand %p967_p11, %p1092_p5 }
  0x17   : > { %s837_s27 = sshll.u32 %s165_s26, 8  ;;  %s972_s26 = scalar_lea.vmem %s971_s25, 4096 }
  0x18   : > { %s1110_s30 = scalar_lea.vmem %s1320_s0, %s837_s27  ;;  %p969_p13 = pneg %p968_p12 }
  0x19   : > { %v170_v5 = vld [vmem:[%s1110_s30] sm:$0xff]  ;;  %v171_v6 = vld [vmem:[%s1110_s30 + $0x8] sm:$0xff]  ;;  %v172_v10 = vld [vmem:[%s1110_s30 + $0x10] sm:$0xff]  ;;  %p974_p1 = scmp.lt.s32.totalorder %s972_s26, %s966_s20 }
  0x1a   : > { %v186_v7 = vld [vmem:[%s1110_s30 + $0x80] sm:$0xff]  ;;  %v202_v8 = vpack.c.bf16 %v171_v6, %v170_v5  ;;  %v187_v9 = vld [vmem:[%s1110_s30 + $0x88] sm:$0xff]  ;;  %v173_v11 = vld [vmem:[%s1110_s30 + $0x18] sm:$0xff] }
  0x1b   : > { %v210_v12 = vpack.c.bf16 %v187_v9, %v186_v7  ;;  %v203_v13 = vpack.c.bf16 %v173_v11, %v172_v10  ;;  %v188_v14 = vld [vmem:[%s1110_s30 + $0x90] sm:$0xff]  ;;  %v189_v15 = vld [vmem:[%s1110_s30 + $0x98] sm:$0xff]  ;;  %v174_v16 = vld [vmem:[%s1110_s30 + $0x20] sm:$0xff]  ;;  %p975_p2 = por %p974_p1, %p973_p0 }
  0x1c   : > { %890 = vmatprep.mubr.msk.bf16.mxu0 %vm226_vm2, %v202_v8  ;;  %v211_v17 = vpack.c.bf16 %v189_v15, %v188_v14  ;;  %v175_v18 = vld [vmem:[%s1110_s30 + $0x28] sm:$0xff]  ;;  %v190_v19 = vld [vmem:[%s1110_s30 + $0xa0] sm:$0xff]  ;;  %v176_v23 = vld [vmem:[%s1110_s30 + $0x30] sm:$0xff] }
  0x1d   : > { %v191_v20 = vld [vmem:[%s1110_s30 + $0xa8] sm:$0xff]  ;;  %906 = vmatprep.mubr.msk.bf16.mxu1 %vm226_vm2, %v210_v12  ;;  %891 = vmatmul.mubr.msk.bf16.vlgmr.msra.gmra.mrb[0].mxu0 %vm226_vm2, %v203_v13  ;;  %v204_v21 = vpack.c.bf16 %v175_v18, %v174_v16  ;;  %v177_v24 = vld [vmem:[%s1110_s30 + $0x38] sm:$0xff]  ;;  %v192_v25 = vld [vmem:[%s1110_s30 + $0xb0] sm:$0xff]  ;;  %p976_p3 = pnand %p975_p2, %p969_p13 }
  0x1e   : > { %v212_v22 = vpack.c.bf16 %v191_v20, %v190_v19  ;;  %907 = vmatmul.mubr.msk.bf16.vlgmr.msra.gmra.mrb[0].mxu1 %vm226_vm2, %v211_v17  ;;  %v193_v26 = vld [vmem:[%s1110_s30 + $0xb8] sm:$0xff]  ;;  %v178_v27 = vld [vmem:[%s1110_s30 + $0x40] sm:$0xff]  ;;  %v179_v28 = vld [vmem:[%s1110_s30 + $0x48] sm:$0xff]  ;;  %v205_v31 = vpack.c.bf16 %v177_v24, %v176_v23 }
  0x1f   : > { %894 = vmatprep.mubr.msk.bf16.mxu0 %vm226_vm2, %v204_v21  ;;  %v194_v29 = vld [vmem:[%s1110_s30 + $0xc0] sm:$0xff]  ;;  %v195_v30 = vld [vmem:[%s1110_s30 + $0xc8] sm:$0xff]  ;;  %v213_v32 = vpack.c.bf16 %v193_v26, %v192_v25  ;;  %v206_v33 = vpack.c.bf16 %v179_v28, %v178_v27  ;;  %v180_v35 = vld [vmem:[%s1110_s30 + $0x50] sm:$0xff] }
  0x20   : > { %910 = vmatprep.mubr.msk.bf16.mxu1 %vm226_vm2, %v212_v22  ;;  %v214_v34 = vpack.c.bf16 %v195_v30, %v194_v29  ;;  %v181_v36 = vld [vmem:[%s1110_s30 + $0x58] sm:$0xff]  ;;  %v196_v37 = vld [vmem:[%s1110_s30 + $0xd0] sm:$0xff]  ;;  %v182_v39 = vld [vmem:[%s1110_s30 + $0x60] sm:$0xff] }
  0x21   : > { %v197_v38 = vld [vmem:[%s1110_s30 + $0xd8] sm:$0xff]  ;;  %v183_v40 = vld [vmem:[%s1110_s30 + $0x68] sm:$0xff]  ;;  %v198_v41 = vld [vmem:[%s1110_s30 + $0xe0] sm:$0xff]  ;;  %v207_v43 = vpack.c.bf16 %v181_v36, %v180_v35 }
  0x22   : > { %v199_v42 = vld [vmem:[%s1110_s30 + $0xe8] sm:$0xff]  ;;  %v215_v44 = vpack.c.bf16 %v197_v38, %v196_v37  ;;  %v208_v45 = vpack.c.bf16 %v183_v40, %v182_v39  ;;  %v184_v47 = vld [vmem:[%s1110_s30 + $0x70] sm:$0xff]  ;;  %v185_v48 = vld [vmem:[%s1110_s30 + $0x78] sm:$0xff] }
  0x23   : > { %v216_v46 = vpack.c.bf16 %v199_v42, %v198_v41  ;;  %v200_v49 = vld [vmem:[%s1110_s30 + $0xf0] sm:$0xff]  ;;  %v201_v50 = vld [vmem:[%s1110_s30 + $0xf8] sm:$0xff]  ;;  %v209_v51 = vpack.c.bf16 %v185_v48, %v184_v47 }
  0x24   : > { %v217_v52 = vpack.c.bf16 %v201_v50, %v200_v49 }
  0x25   : > { %895 = vmatmul.mubr.msk.bf16.gmra.mrb[4].mxu0 %vm226_vm2, %v205_v31 }
  0x26   : > { %911 = vmatmul.mubr.msk.bf16.gmra.mrb[4].mxu1 %vm226_vm2, %v213_v32  ;;  %898 = vmatprep.mubr.msk.bf16.mxu0 %vm226_vm2, %v206_v33 }
  0x27   : > { %914 = vmatprep.mubr.msk.bf16.mxu1 %vm226_vm2, %v214_v34 }
  0x2d   : > { %899 = vmatmul.mubr.msk.bf16.gmra.mrb[8].mxu0 %vm226_vm2, %v207_v43 }
  0x2e   : > { %915 = vmatmul.mubr.msk.bf16.gmra.mrb[8].mxu1 %vm226_vm2, %v215_v44  ;;  %902 = vmatprep.mubr.msk.bf16.mxu0 %vm226_vm2, %v208_v45 }
  0x2f   : > { %918 = vmatprep.mubr.msk.bf16.mxu1 %vm226_vm2, %v216_v46 }
  0x35   : > { %903 = vmatmul.mubr.msk.bf16.gmra.mrb[12].mxu0 %vm226_vm2, %v209_v51 }
  0x36   : > { %919 = vmatmul.mubr.msk.bf16.gmra.mrb[12].mxu1 %vm226_vm2, %v217_v52 }
  0xf0   : > { %v892_v54 = vpop.f32.mrb[0].mxu0 }
  0xf1   : > { %v325_v55 = vadd.f32 %v892_v54, %v1163_v53  ;;  %v908_v56 = vpop.f32.mrb[0].mxu1  ;;  %v316_v57 = vpop.f32.mrb[1].mxu0 }
  0xf2   : > { %v389_v58 = vadd.f32 %v908_v56, %v1163_v53  ;;  %v317_v59 = vadd.f32 %v1163_v53, %v316_v57  ;;  %v380_v60 = vpop.f32.mrb[1].mxu1  ;;  %v893_v61 = vpop.f32.mrb[2].mxu0 }
  0xf3   : > { %vm445_vm4 = vcmp.ge.f32.partialorder %v325_v55, 0.0  ;;  %v477_v62 = vmul.f32 0.2, %v325_v55  ;;  %v381_v63 = vadd.f32 %v1163_v53, %v380_v60  ;;  %v328_v0 = vadd.f32 %v893_v61, %v1163_v53  ;;  %v909_v1 = vpop.f32.mrb[2].mxu1  ;;  %v319_v2 = vpop.f32.mrb[3].mxu0 }
  0xf4   : > { %vm461_vm5 = vcmp.ge.f32.partialorder %v389_v58, 0.0  ;;  %v493_v3 = vmul.f32 0.2, %v389_v58  ;;  %vm443_vm6 = vcmp.ge.f32.partialorder %v317_v59, 0.0  ;;  %v475_v4 = vmul.f32 0.2, %v317_v59 }
  0xf5   : > { %v509_v5 = vsel %vm445_vm4, %v325_v55, %v477_v62  ;;  %vm459_vm7 = vcmp.ge.f32.partialorder %v381_v63, 0.0  ;;  %v491_v6 = vmul.f32 0.2, %v381_v63  ;;  %vm446_vm8 = vcmp.ge.f32.partialorder %v328_v0, 0.0  ;;  %v383_v7 = vpop.f32.mrb[3].mxu1 }
  0xf6   : > { %v840_v8 = vpack.c.bf16 %v509_v5, %v509_v5  ;;  %v525_v9 = vsel %vm461_vm5, %v389_v58, %v493_v3  ;;  %v507_v10 = vsel %vm443_vm6, %v317_v59, %v475_v4  ;;  %v478_v11 = vmul.f32 0.2, %v328_v0 }
  0xf7   : > { %v856_v12 = vpack.c.bf16 %v525_v9, %v525_v9  ;;  %v838_v13 = vpack.c.bf16 %v507_v10, %v507_v10  ;;  %v523_v14 = vsel %vm459_vm7, %v381_v63, %v491_v6  ;;  %v392_v15 = vadd.f32 %v909_v1, %v1163_v53 }
  0xf8   : > { %670 = vst.msk [vmem:[%s1174_s8 + $0x8] sm:$0xf] %vm667_vm3, %v840_v8  ;;  %v854_v16 = vpack.c.bf16 %v523_v14, %v523_v14  ;;  %v510_v17 = vsel %vm446_vm8, %v328_v0, %v478_v11  ;;  %v320_v18 = vadd.f32 %v1163_v53, %v319_v2  ;;  %v384_v19 = vadd.f32 %v1163_v53, %v383_v7  ;;  %v896_v20 = vpop.f32.mrb[4].mxu0 }
  0xf9   : > { %686 = vst.msk [vmem:[%s1174_s8 + $0x48] sm:$0xf] %vm667_vm3, %v856_v12  ;;  %668 = vst.msk [vmem:[%s1174_s8] sm:$0xf] %vm667_vm3, %v838_v13  ;;  %v841_v21 = vpack.c.bf16 %v510_v17, %v510_v17  ;;  %vm462_vm9 = vcmp.ge.f32.partialorder %v392_v15, 0.0  ;;  %v341_v23 = vadd.f32 %v896_v20, %v1163_v53  ;;  %v912_v24 = vpop.f32.mrb[4].mxu1 }
  0xfa   : > { %v494_v22 = vmul.f32 0.2, %v392_v15  ;;  %v332_v25 = vpop.f32.mrb[5].mxu0  ;;  %684 = vst.msk [vmem:[%s1174_s8 + $0x40] sm:$0xf] %vm667_vm3, %v854_v16  ;;  %vm444_vm10 = vcmp.ge.f32.partialorder %v320_v18, 0.0  ;;  %v405_v30 = vadd.f32 %v912_v24, %v1163_v53 }
  0xfb   : > { %v476_v26 = vmul.f32 0.2, %v320_v18  ;;  %vm460_vm11 = vcmp.ge.f32.partialorder %v384_v19, 0.0  ;;  %v492_v27 = vmul.f32 0.2, %v384_v19  ;;  %vm449_vm12 = vcmp.ge.f32.partialorder %v341_v23, 0.0 }
  0xfc   : > { %671 = vst.msk [vmem:[%s1174_s8 + $0xc] sm:$0xf] %vm667_vm3, %v841_v21  ;;  %v526_v28 = vsel %vm462_vm9, %v392_v15, %v494_v22  ;;  %v481_v29 = vmul.f32 0.2, %v341_v23  ;;  %v396_v31 = vpop.f32.mrb[5].mxu1  ;;  %v897_v32 = vpop.f32.mrb[6].mxu0  ;;  %v333_v36 = vadd.f32 %v1163_v53, %v332_v25 }
  0xfd   : > { %v857_v33 = vpack.c.bf16 %v526_v28, %v526_v28  ;;  %v508_v34 = vsel %vm444_vm10, %v320_v18, %v476_v26  ;;  %v524_v35 = vsel %vm460_vm11, %v384_v19, %v492_v27  ;;  %v913_v37 = vpop.f32.mrb[6].mxu1  ;;  %v335_v38 = vpop.f32.mrb[7].mxu0  ;;  %vm465_vm13 = vcmp.ge.f32.partialorder %v405_v30, 0.0 }
  0xfe   : > { %v839_v39 = vpack.c.bf16 %v508_v34, %v508_v34  ;;  %v855_v40 = vpack.c.bf16 %v524_v35, %v524_v35  ;;  %v513_v41 = vsel %vm449_vm12, %v341_v23, %v481_v29  ;;  %v399_v42 = vpop.f32.mrb[7].mxu1  ;;  %v497_v44 = vmul.f32 0.2, %v405_v30 }
  0xff   : > { %687 = vst.msk [vmem:[%s1174_s8 + $0x4c] sm:$0xf] %vm667_vm3, %v857_v33  ;;  %v844_v43 = vpack.c.bf16 %v513_v41, %v513_v41  ;;  %vm447_vm14 = vcmp.ge.f32.partialorder %v333_v36, 0.0  ;;  %v479_v45 = vmul.f32 0.2, %v333_v36  ;;  %v397_v46 = vadd.f32 %v1163_v53, %v396_v31 }
 0x100   : > { %669 = vst.msk [vmem:[%s1174_s8 + $0x4] sm:$0xf] %vm667_vm3, %v839_v39  ;;  %685 = vst.msk [vmem:[%s1174_s8 + $0x44] sm:$0xf] %vm667_vm3, %v855_v40  ;;  %v344_v47 = vadd.f32 %v897_v32, %v1163_v53  ;;  %v408_v48 = vadd.f32 %v913_v37, %v1163_v53  ;;  %v336_v49 = vadd.f32 %v1163_v53, %v335_v38  ;;  %v900_v54 = vpop.f32.mrb[8].mxu0 }
 0x101   : > { %674 = vst.msk [vmem:[%s1174_s8 + $0x18] sm:$0xf] %vm667_vm3, %v844_v43  ;;  %v529_v50 = vsel %vm465_vm13, %v405_v30, %v497_v44  ;;  %v511_v51 = vsel %vm447_vm14, %v333_v36, %v479_v45  ;;  %v400_v52 = vadd.f32 %v1163_v53, %v399_v42  ;;  %vm463_vm15 = vcmp.ge.f32.partialorder %v397_v46, 0.0  ;;  %v916_v58 = vpop.f32.mrb[8].mxu1  ;;  %v348_v59 = vpop.f32.mrb[9].mxu0 }
 0x102   : > { %v860_v55 = vpack.c.bf16 %v529_v50, %v529_v50  ;;  %v842_v56 = vpack.c.bf16 %v511_v51, %v511_v51  ;;  %v495_v57 = vmul.f32 0.2, %v397_v46  ;;  %vm450_vm0 = vcmp.ge.f32.partialorder %v344_v47, 0.0  ;;  %v412_v0 = vpop.f32.mrb[9].mxu1  ;;  %v901_v1 = vpop.f32.mrb[10].mxu0 }
 0x103   : > { %v482_v60 = vmul.f32 0.2, %v344_v47  ;;  %vm466_vm1 = vcmp.ge.f32.partialorder %v408_v48, 0.0  ;;  %v498_v61 = vmul.f32 0.2, %v408_v48  ;;  %vm448_vm2 = vcmp.ge.f32.partialorder %v336_v49, 0.0 }
 0x104   : > { %690 = vst.msk [vmem:[%s1174_s8 + $0x58] sm:$0xf] %vm667_vm3, %v860_v55  ;;  %672 = vst.msk [vmem:[%s1174_s8 + $0x10] sm:$0xf] %vm667_vm3, %v842_v56  ;;  %v527_v62 = vsel %vm463_vm15, %v397_v46, %v495_v57  ;;  %v480_v63 = vmul.f32 0.2, %v336_v49  ;;  %v357_v11 = vadd.f32 %v900_v54, %v1163_v53  ;;  %v421_v15 = vadd.f32 %v916_v58, %v1163_v53 }
 0x105   : > { %vm464_vm4 = vcmp.ge.f32.partialorder %v400_v52, 0.0  ;;  %v858_v2 = vpack.c.bf16 %v527_v62, %v527_v62  ;;  %v514_v3 = vsel %vm450_vm0, %v344_v47, %v482_v60  ;;  %v530_v4 = vsel %vm466_vm1, %v408_v48, %v498_v61  ;;  %v917_v6 = vpop.f32.mrb[10].mxu1  ;;  %v351_v7 = vpop.f32.mrb[11].mxu0 }
 0x106   : > { %v496_v5 = vmul.f32 0.2, %v400_v52  ;;  %v845_v8 = vpack.c.bf16 %v514_v3, %v514_v3  ;;  %v861_v9 = vpack.c.bf16 %v530_v4, %v530_v4  ;;  %v512_v10 = vsel %vm448_vm2, %v336_v49, %v480_v63  ;;  %v415_v12 = vpop.f32.mrb[11].mxu1 }
 0x107   : > { %688 = vst.msk [vmem:[%s1174_s8 + $0x50] sm:$0xf] %vm667_vm3, %v858_v2  ;;  %v843_v13 = vpack.c.bf16 %v512_v10, %v512_v10  ;;  %v349_v16 = vadd.f32 %v1163_v53, %v348_v59  ;;  %vm453_vm5 = vcmp.ge.f32.partialorder %v357_v11, 0.0  ;;  %v485_v18 = vmul.f32 0.2, %v357_v11 }
 0x108   : > { %v528_v14 = vsel %vm464_vm4, %v400_v52, %v496_v5  ;;  %675 = vst.msk [vmem:[%s1174_s8 + $0x1c] sm:$0xf] %vm667_vm3, %v845_v8  ;;  %691 = vst.msk [vmem:[%s1174_s8 + $0x5c] sm:$0xf] %vm667_vm3, %v861_v9  ;;  %v413_v19 = vadd.f32 %v1163_v53, %v412_v0  ;;  %vm469_vm6 = vcmp.ge.f32.partialorder %v421_v15, 0.0  ;;  %v360_v24 = vadd.f32 %v901_v1, %v1163_v53  ;;  %v904_v25 = vpop.f32.mrb[12].mxu0 }
 0x109   : > { %v859_v17 = vpack.c.bf16 %v528_v14, %v528_v14  ;;  %673 = vst.msk [vmem:[%s1174_s8 + $0x14] sm:$0xf] %vm667_vm3, %v843_v13  ;;  %v501_v20 = vmul.f32 0.2, %v421_v15  ;;  %vm451_vm7 = vcmp.ge.f32.partialorder %v349_v16, 0.0  ;;  %v517_v22 = vsel %vm453_vm5, %v357_v11, %v485_v18  ;;  %v920_v26 = vpop.f32.mrb[12].mxu1 }
 0x10a   : > { %v483_v21 = vmul.f32 0.2, %v349_v16  ;;  %vm467_vm8 = vcmp.ge.f32.partialorder %v413_v19, 0.0  ;;  %v499_v23 = vmul.f32 0.2, %v413_v19  ;;  %v848_v27 = vpack.c.bf16 %v517_v22, %v517_v22  ;;  %v364_v31 = vpop.f32.mrb[13].mxu0 }
 0x10b   : > { %689 = vst.msk [vmem:[%s1174_s8 + $0x54] sm:$0xf] %vm667_vm3, %v859_v17  ;;  %v533_v28 = vsel %vm469_vm6, %v421_v15, %v501_v20  ;;  %v424_v30 = vadd.f32 %v917_v6, %v1163_v53  ;;  %v428_v32 = vpop.f32.mrb[13].mxu1  ;;  %vm454_vm9 = vcmp.ge.f32.partialorder %v360_v24, 0.0  ;;  %v905_v36 = vpop.f32.mrb[14].mxu0  ;;  %v352_v42 = vadd.f32 %v1163_v53, %v351_v7 }
 0x10c   : > { %v515_v29 = vsel %vm451_vm7, %v349_v16, %v483_v21  ;;  %v864_v33 = vpack.c.bf16 %v533_v28, %v533_v28  ;;  %v531_v35 = vsel %vm467_vm8, %v413_v19, %v499_v23  ;;  %v921_v37 = vpop.f32.mrb[14].mxu1  ;;  %678 = vst.msk [vmem:[%s1174_s8 + $0x28] sm:$0xf] %vm667_vm3, %v848_v27  ;;  %v486_v39 = vmul.f32 0.2, %v360_v24  ;;  %v367_v41 = vpop.f32.mrb[15].mxu0 }
 0x10d   : > { %v846_v34 = vpack.c.bf16 %v515_v29, %v515_v29  ;;  %v862_v38 = vpack.c.bf16 %v531_v35, %v531_v35  ;;  %vm470_vm10 = vcmp.ge.f32.partialorder %v424_v30, 0.0  ;;  %v502_v40 = vmul.f32 0.2, %v424_v30  ;;  %v431_v46 = vpop.f32.mrb[15].mxu1 }
 0x10e   : > { %694 = vst.msk [vmem:[%s1174_s8 + $0x68] sm:$0xf] %vm667_vm3, %v864_v33  ;;  %v416_v43 = vadd.f32 %v1163_v53, %v415_v12  ;;  %v373_v44 = vadd.f32 %v904_v25, %v1163_v53  ;;  %v437_v45 = vadd.f32 %v920_v26, %v1163_v53  ;;  %v518_v47 = vsel %vm454_vm9, %v360_v24, %v486_v39 }
 0x10f   : > { %676 = vst.msk [vmem:[%s1174_s8 + $0x20] sm:$0xf] %vm667_vm3, %v846_v34  ;;  %692 = vst.msk [vmem:[%s1174_s8 + $0x60] sm:$0xf] %vm667_vm3, %v862_v38  ;;  %v534_v48 = vsel %vm470_vm10, %v424_v30, %v502_v40  ;;  %v365_v49 = vadd.f32 %v1163_v53, %v364_v31  ;;  %v429_v50 = vadd.f32 %v1163_v53, %v428_v32  ;;  %vm452_vm11 = vcmp.ge.f32.partialorder %v352_v42, 0.0 }
 0x110   : > { %v849_v51 = vpack.c.bf16 %v518_v47, %v518_v47  ;;  %v865_v52 = vpack.c.bf16 %v534_v48, %v534_v48  ;;  %v484_v54 = vmul.f32 0.2, %v352_v42  ;;  %vm468_vm12 = vcmp.ge.f32.partialorder %v416_v43, 0.0 }
 0x111   : > { %v500_v55 = vmul.f32 0.2, %v416_v43  ;;  %vm457_vm13 = vcmp.ge.f32.partialorder %v373_v44, 0.0  ;;  %v489_v56 = vmul.f32 0.2, %v373_v44  ;;  %vm473_vm14 = vcmp.ge.f32.partialorder %v437_v45, 0.0 }
 0x112   : > { %679 = vst.msk [vmem:[%s1174_s8 + $0x2c] sm:$0xf] %vm667_vm3, %v849_v51  ;;  %695 = vst.msk [vmem:[%s1174_s8 + $0x6c] sm:$0xf] %vm667_vm3, %v865_v52  ;;  %v516_v57 = vsel %vm452_vm11, %v352_v42, %v484_v54  ;;  %v505_v58 = vmul.f32 0.2, %v437_v45  ;;  %v376_v5 = vadd.f32 %v905_v36, %v1163_v53  ;;  %v440_v7 = vadd.f32 %v921_v37, %v1163_v53 }
 0x113   : > { %vm455_vm15 = vcmp.ge.f32.partialorder %v365_v49, 0.0  ;;  %v847_v59 = vpack.c.bf16 %v516_v57, %v516_v57  ;;  %v532_v60 = vsel %vm468_vm12, %v416_v43, %v500_v55  ;;  %v521_v61 = vsel %vm457_vm13, %v373_v44, %v489_v56 }
 0x114   : > { %v487_v62 = vmul.f32 0.2, %v365_v49  ;;  %v863_v63 = vpack.c.bf16 %v532_v60, %v532_v60  ;;  %v852_v0 = vpack.c.bf16 %v521_v61, %v521_v61  ;;  %v537_v1 = vsel %vm473_vm14, %v437_v45, %v505_v58 }
 0x115   : > { %vm471_vm0 = vcmp.ge.f32.partialorder %v429_v50, 0.0  ;;  %677 = vst.msk [vmem:[%s1174_s8 + $0x24] sm:$0xf] %vm667_vm3, %v847_v59  ;;  %v868_v2 = vpack.c.bf16 %v537_v1, %v537_v1  ;;  %v503_v4 = vmul.f32 0.2, %v429_v50  ;;  %v368_v8 = vadd.f32 %v1163_v53, %v367_v41 }
 0x116   : > { %v519_v3 = vsel %vm455_vm15, %v365_v49, %v487_v62  ;;  %693 = vst.msk [vmem:[%s1174_s8 + $0x64] sm:$0xf] %vm667_vm3, %v863_v63  ;;  %682 = vst.msk [vmem:[%s1174_s8 + $0x38] sm:$0xf] %vm667_vm3, %v852_v0  ;;  %v432_v9 = vadd.f32 %v1163_v53, %v431_v46  ;;  %vm458_vm1 = vcmp.ge.f32.partialorder %v376_v5, 0.0  ;;  %vm474_vm2 = vcmp.ge.f32.partialorder %v440_v7, 0.0 }
 0x117   : > { %v850_v6 = vpack.c.bf16 %v519_v3, %v519_v3  ;;  %698 = vst.msk [vmem:[%s1174_s8 + $0x78] sm:$0xf] %vm667_vm3, %v868_v2  ;;  %v535_v10 = vsel %vm471_vm0, %v429_v50, %v503_v4  ;;  %v490_v11 = vmul.f32 0.2, %v376_v5  ;;  %v506_v13 = vmul.f32 0.2, %v440_v7 }
 0x118   : > { %v866_v12 = vpack.c.bf16 %v535_v10, %v535_v10  ;;  %vm456_vm4 = vcmp.ge.f32.partialorder %v368_v8, 0.0  ;;  %v488_v15 = vmul.f32 0.2, %v368_v8  ;;  %vm472_vm5 = vcmp.ge.f32.partialorder %v432_v9, 0.0 }
 0x119   : > { %680 = vst.msk [vmem:[%s1174_s8 + $0x30] sm:$0xf] %vm667_vm3, %v850_v6  ;;  %v522_v14 = vsel %vm458_vm1, %v376_v5, %v490_v11  ;;  %v504_v53 = vmul.f32 0.2, %v432_v9  ;;  %v538_v17 = vsel %vm474_vm2, %v440_v7, %v506_v13 }
 0x11a   : > { %696 = vst.msk [vmem:[%s1174_s8 + $0x70] sm:$0xf] %vm667_vm3, %v866_v12  ;;  %v853_v16 = vpack.c.bf16 %v522_v14, %v522_v14  ;;  %v869_v18 = vpack.c.bf16 %v538_v17, %v538_v17  ;;  %v520_v19 = vsel %vm456_vm4, %v368_v8, %v488_v15 }
 0x11b   : > { %v536_v20 = vsel %vm472_vm5, %v432_v9, %v504_v53  ;;  %v851_v21 = vpack.c.bf16 %v520_v19, %v520_v19 }
 0x11c   : > { %683 = vst.msk [vmem:[%s1174_s8 + $0x3c] sm:$0xf] %vm667_vm3, %v853_v16  ;;  %v867_v22 = vpack.c.bf16 %v536_v20, %v536_v20  ;;  %699 = vst.msk [vmem:[%s1174_s8 + $0x7c] sm:$0xf] %vm667_vm3, %v869_v18 }
 0x11d   : > { %681 = vst.msk [vmem:[%s1174_s8 + $0x34] sm:$0xf] %vm667_vm3, %v851_v21 }
 0x11e   : > { %697 = vst.msk [vmem:[%s1174_s8 + $0x74] sm:$0xf] %vm667_vm3, %v867_v22 }
 0x11f   : > { %979 = shalt.err (!%p976_p3)
}
 0x120   : > { %s980_s27 = scalar_lea.hbm %s1265_s16, 2048  ;;  %s984_s30 = scalar_lea.hbm %s1323_s3, 4096 }
 0x121   : > { %p981_p4 = scmp.ne.s32.totalorder %s1265_s16, %s980_s27  ;;  %p985_p9 = scmp.lt.u32.totalorder %s1265_s16, %s1323_s3 }
 0x122   : > { %p986_p10 = scmp.lt.u32.totalorder %s984_s30, %s980_s27  ;;  %p988_p12 = scmp.lt.u32.totalorder %s980_s27, %s1265_s16 }
 0x123   : > { %p982_p7 = pnand %p981_p4, %p1092_p5 }
 0x124   : > { %p987_p11 = por %p986_p10, %p985_p9 }
 0x125   : > { %p983_p8 = pneg %p982_p7 }
 0x126   : > { %p989_p13 = por %p988_p12, %p987_p11 }
 0x128   : > { %p990_p0 = pnand %p989_p13, %p983_p8 }
 0x12a   : > { %993 = shalt.err (!%p990_p0)
}
 0x12b   : > { %s1032_s6 = smov 64   ;;  %s1033_s7 = smov 4  }
 0x12c   : > { %924 = dma.vmem_to_hbm [thread:$0]  (%p1092_p5), %s1267_s10, 2048, %s1265_s16, %s1279_s19, %s1032_s6, %s1032_s6, %s1033_s7  }
 0x12d PF: > { %p930_p1 = scmp.ge.s32.totalorder %s1028_s15, 2  ;;  %s729_s8 = sand.u32 1, %s1016_s12  }
 0x12e   : > { %s730_s9 = scalar_lea.sflag [#allocation3], %s729_s8 }
 0x12f   : > { %p927_p2 = pnand %p930_p1, %p1096_p6 }
 0x131   : > { %1011 = dma.done.wait (!%p927_p2), %s730_s9, 2048  }
 0x132   : > { %1013 = vsyncadd (!%p927_p2), %s730_s9, 4294965248  ;;  %p13_p3 = scmp.ge.s32.totalorder %s1079_s18, 4   ;;  %s1326_s12 = smov %s1020_s13 }
 0x133   : > { %s1327_s13 = smov %s1024_s14  ;;  %s1328_s14 = smov %s1090_s21 }
 0x134   : > { %s1329_s15 = smov %s1079_s18  ;;  %15 = sbr.rel (!%p13_p3) target bundleno = 3 (0x3), region = 67 }
 0x13b   :  { %735 = vsyncpa [#allocation3], 1 }
 0x13c   :  { %737 = vsyncpa [#allocation3 + $0x1], 1 }

</bundles_post_ra>
